<compile_context>
chip_gen: v6e
topology: v6e:2x2x1
jax: 0.10.0
libtpu: 0.0.40
codegen_flags: <defaults>
</compile_context>

<pallas_src>
import functools

import jax
import jax.numpy as jnp
from jax.experimental import pallas as pl
from jax.experimental.pallas import tpu as pltpu


# ---------------------------------------------------------------------------
# Kernels
# ---------------------------------------------------------------------------

def _gated_rmsnorm_kernel(x_ref, z_ref, w_ref, o_ref, *, eps, gate_dtype):
    # x_ref, z_ref, o_ref: (block_rows, d) ; w_ref: (1, d)
    x = x_ref[...].astype(gate_dtype)
    z = z_ref[...].astype(gate_dtype)
    # gate: x * silu(z) -- kept in gate_dtype (bf16 on v6e/v7x bf16 inputs).
    g = x * (z * jax.nn.sigmoid(z))
    # RMS statistic over the lane axis always in f32 (accuracy).
    gf = g.astype(jnp.float32)
    ms = jnp.mean(gf * gf, axis=-1, keepdims=True)
    inv = jax.lax.rsqrt(ms + eps)
    w = w_ref[...].astype(jnp.float32)
    o_ref[...] = (gf * inv * w).astype(o_ref.dtype)


def _rmsnorm_kernel(x_ref, w_ref, o_ref, *, eps):
    x = x_ref[...].astype(jnp.float32)
    ms = jnp.mean(x * x, axis=-1, keepdims=True)
    inv = jax.lax.rsqrt(ms + eps)
    w = w_ref[...].astype(jnp.float32)
    o_ref[...] = (x * inv * w).astype(o_ref.dtype)


# ---------------------------------------------------------------------------
# Generation-aware sizing
# ---------------------------------------------------------------------------

def _round_up(n, m):
    return ((n + m - 1) // m) * m


def _chip_params():
    """Returns (scoped_vmem_limit_bytes, num_tensorcores, has_bf16_vpu)."""
    kind = ""
    try:
        kind = jax.devices()[0].device_kind.lower()
    except Exception:
        pass
    if ("v7" in kind) or ("7x" in kind):
        # v7x: 64 MiB VMEM per TC, 2 TCs/chip, bf16 VPU/EUP. Leave Mosaic
        # internal-scratch headroom below the 64 MiB physical limit.
        return 44 * 1024 * 1024, 2, True
    if "v6" in kind:
        # v6e: 128 MiB VMEM, single TC, bf16 VPU/EUP.
        return 64 * 1024 * 1024, 1, True
    if "v5" in kind:
        # v5e/v5p: 128 MiB VMEM, single TC, no bf16 VPU/EUP (stay f32).
        return 64 * 1024 * 1024, 1, False
    # Unknown chip: conservative budget that fits every generation.
    return 32 * 1024 * 1024, 2, False


def _pick_block_rows(rows, d, itemsize, n_streams, vmem_limit, num_cores):
    """Pick a sublane-aligned row-tile size.

    Targets ~4 MiB per streamed tile (larger for the 2-stream ungated path),
    bounded by the explicit VMEM budget including double-buffered streams and
    the f32-wide in-kernel intermediates.
    """
    sub = {4: 8, 2: 16, 1: 32}.get(itemsize, 8)
    row_bytes = max(1, d * itemsize)

    # ~4 MiB per stream tile; the ungated path (2 streams) gets ~1.5x more.
    target_tile_bytes = (4 * 1024 * 1024) * 3 // max(1, n_streams)

    # Per-block-row VMEM cost: n_streams double-buffered tiles plus ~2 f32-wide
    # intermediates (gated x and the squared term feeding the lane reduce).
    bytes_per_block_row = n_streams * 2 * row_bytes + 2 * d * 4
    vmem_budget = int(vmem_limit * 0.85)  # headroom for weight block / scratch
    max_rows_by_vmem = max(sub, (vmem_budget // bytes_per_block_row) // sub * sub)

    br = max(sub, (target_tile_bytes // row_bytes) // sub * sub)
    br = min(br, max_rows_by_vmem)
    br = min(br, _round_up(rows, sub))

    # Only multi-TC chips (v7x) need several grid steps so the "parallel" axis
    # can shard across cores; single-TC v5e/v6e take the biggest tile.
    if num_cores > 1:
        min_steps = 2 * num_cores
        if rows >= min_steps * sub:
            br = min(br, max(sub, _round_up(pl.cdiv(rows, min_steps), sub)))
    return max(sub, br)


# ---------------------------------------------------------------------------
# Wrapper
# ---------------------------------------------------------------------------

def gated_rms_norm(x, weight, z=None, *, eps=1e-5, block_rows=None):
    """Matches GatedRMSNorm.forward(x, z). x, z: (..., d); weight: (d,)."""
    orig_shape = x.shape
    d = orig_shape[-1]
    rows = 1
    for s in orig_shape[:-1]:
        rows *= s

    x2 = x.reshape(rows, d)
    w2 = weight.reshape(1, d)
    itemsize = jnp.dtype(x.dtype).itemsize
    n_streams = 3 if z is not None else 2  # (x, z, out) vs (x, out)

    vmem_limit, num_cores, has_bf16_vpu = _chip_params()
    if block_rows is None:
        block_rows = _pick_block_rows(rows, d, itemsize, n_streams,
                                      vmem_limit, num_cores)

    grid = (pl.cdiv(rows, block_rows),)

    row_spec = pl.BlockSpec((block_rows, d), lambda i: (i, 0))
    w_spec = pl.BlockSpec((1, d), lambda i: (0, 0))  # constant block -> fetched once
    out_shape = jax.ShapeDtypeStruct((rows, d), x.dtype)
    cparams = pltpu.CompilerParams(
        dimension_semantics=("parallel",),
        vmem_limit_bytes=vmem_limit,
    )

    if z is not None:
        # Keep the gating math in bf16 when inputs are bf16 and the chip has a
        # bf16 VPU/EUP (v6e/v7x); statistics stay f32 inside the kernel.
        if has_bf16_vpu and x.dtype == jnp.bfloat16:
            gate_dtype = jnp.bfloat16
        else:
            gate_dtype = jnp.float32
        z2 = z.reshape(rows, d)
        out = pl.pallas_call(
            functools.partial(_gated_rmsnorm_kernel, eps=eps,
                              gate_dtype=gate_dtype),
            out_shape=out_shape,
            grid_spec=pltpu.PrefetchScalarGridSpec(
                num_scalar_prefetch=0,
                grid=grid,
                in_specs=[row_spec, row_spec, w_spec],
                out_specs=row_spec,
            ),
            compiler_params=cparams,
        )(x2, z2, w2)
    else:
        out = pl.pallas_call(
            functools.partial(_rmsnorm_kernel, eps=eps),
            out_shape=out_shape,
            grid_spec=pltpu.PrefetchScalarGridSpec(
                num_scalar_prefetch=0,
                grid=grid,
                in_specs=[row_spec, w_spec],
                out_specs=row_spec,
            ),
            compiler_params=cparams,
        )(x2, w2)

    return out.reshape(orig_shape)


# ---------------------------------------------------------------------------
# Reference & smoke tests
# ---------------------------------------------------------------------------

def _reference(x, weight, z=None, eps=1e-5):
    x = x.astype(jnp.float32)
    if z is not None:
        z = z.astype(jnp.float32)
        x = x * (z * jax.nn.sigmoid(z))
    inv = jax.lax.rsqrt(jnp.mean(x * x, axis=-1, keepdims=True) + eps)
    return x * inv * weight.astype(jnp.float32)


if __name__ == "__main__":
    key = jax.random.PRNGKey(0)
    kx, kz, kx2, kz2, kx3, kz3 = jax.random.split(key, 6)

    # Small smoke-test shape matching the module. NOTE: d=32 is lane-sparse and
    # correctness-only; the intended performance regime is d >= 128.
    batch, seq, d = 2, 8, 32
    x = jax.random.normal(kx, (batch, seq, d), dtype=jnp.float32)
    z = jax.random.normal(kz, (batch, seq, d), dtype=jnp.float32)
    weight = jnp.ones((d,), dtype=jnp.float32)  # nn.Parameter(torch.ones(d))

    # gated path (z provided)
    out_gated = jax.block_until_ready(gated_rms_norm(x, weight, z=z, eps=1e-5))
    ref_gated = _reference(x, weight, z=z)
    assert out_gated.shape == x.shape
    assert jnp.allclose(out_gated, ref_gated, atol=1e-5, rtol=1e-5), "gated mismatch"

    # ungated path (z=None)
    out_plain = jax.block_until_ready(gated_rms_norm(x, weight, z=None, eps=1e-5))
    ref_plain = _reference(x, weight, z=None)
    assert jnp.allclose(out_plain, ref_plain, atol=1e-5, rtol=1e-5), "ungated mismatch"

    # Ragged row count (rows % block_rows != 0) exercises the pad-free boundary
    # path (masked writes on the final block) with a lane-dense d.
    b2, s2, d2 = 3, 5, 128
    xr = jax.random.normal(kx2, (b2, s2, d2), dtype=jnp.float32)
    zr = jax.random.normal(kz2, (b2, s2, d2), dtype=jnp.float32)
    wr = jnp.ones((d2,), dtype=jnp.float32)
    out_r = jax.block_until_ready(gated_rms_norm(xr, wr, z=zr, eps=1e-5))
    ref_r = _reference(xr, wr, z=zr)
    assert jnp.allclose(out_r, ref_r, atol=1e-5, rtol=1e-5), "ragged mismatch"

    # bf16 gated path (exercises the bf16-gating fast path on v6e/v7x; looser
    # tolerance since bf16 gating rounds before the f32 statistic).
    b3, s3, d3 = 2, 8, 128
    xb = jax.random.normal(kx3, (b3, s3, d3), dtype=jnp.float32).astype(jnp.bfloat16)
    zb = jax.random.normal(kz3, (b3, s3, d3), dtype=jnp.float32).astype(jnp.bfloat16)
    wb = jnp.ones((d3,), dtype=jnp.float32)
    out_b = jax.block_until_ready(gated_rms_norm(xb, wb, z=zb, eps=1e-5))
    ref_b = _reference(xb, wb, z=zb)
    assert out_b.dtype == jnp.bfloat16
    assert jnp.allclose(out_b.astype(jnp.float32), ref_b, atol=3e-2, rtol=3e-2), \
        "bf16 gated mismatch"

    print("KERNEL_OK")
</pallas_src>

<mosaic_0001>
module attributes {stable_mosaic.version = 11 : i64} {
  func.func @_gated_rmsnorm_kernel(%arg0: i32, %arg1: memref<16x32xf32, #tpu.memory_space<vmem>>, %arg2: memref<16x32xf32, #tpu.memory_space<vmem>>, %arg3: memref<1x32xf32, #tpu.memory_space<vmem>>, %arg4: memref<16x32xf32, #tpu.memory_space<vmem>>) attributes {dimension_semantics = [#tpu.dimension_semantics<parallel>], iteration_bounds = array<i64: 1>, scalar_prefetch = 0 : i64, scratch_operands = 0 : i64, tpu.core_type = #tpu.core_type<tc>, window_params = [{transform_indices = @transform_0, window_bounds = array<i64: 16, 32>}, {transform_indices = @transform_1, window_bounds = array<i64: 16, 32>}, {pipeline_mode = #tpu.pipeline_mode<synchronous>, transform_indices = @transform_2, window_bounds = array<i64: 1, 32>}, {transform_indices = @transform_3, window_bounds = array<i64: 16, 32>}]} {
    %c0 = arith.constant 0 : index
    %c0_0 = arith.constant 0 : index
    %0 = vector.load %arg1[%c0, %c0_0] : memref<16x32xf32, #tpu.memory_space<vmem>>, vector<16x32xf32>
    %c0_1 = arith.constant 0 : index
    %c0_2 = arith.constant 0 : index
    %1 = vector.load %arg2[%c0_1, %c0_2] : memref<16x32xf32, #tpu.memory_space<vmem>>, vector<16x32xf32>
    %2 = arith.negf %1 : vector<16x32xf32>
    %3 = math.exp %2 : vector<16x32xf32>
    %cst = arith.constant 1.000000e+00 : f32
    %4 = vector.broadcast %cst : f32 to vector<16x32xf32>
    %5 = arith.addf %4, %3 : vector<16x32xf32>
    %6 = arith.divf %4, %5 : vector<16x32xf32>
    %7 = arith.mulf %1, %6 : vector<16x32xf32>
    %8 = arith.mulf %0, %7 : vector<16x32xf32>
    %9 = arith.mulf %8, %8 : vector<16x32xf32>
    %cst_3 = arith.constant dense<0.000000e+00> : vector<16xf32>
    %10 = vector.multi_reduction <add>, %9, %cst_3 [1] : vector<16x32xf32> to vector<16xf32>
    %11 = vector.shape_cast %10 : vector<16xf32> to vector<16x1xf32>
    %cst_4 = arith.constant 3.200000e+01 : f32
    %12 = vector.broadcast %cst_4 : f32 to vector<16x1xf32>
    %13 = arith.divf %11, %12 : vector<16x1xf32>
    %cst_5 = arith.constant 9.99999974E-6 : f32
    %14 = vector.broadcast %cst_5 : f32 to vector<16x1xf32>
    %15 = arith.addf %13, %14 : vector<16x1xf32>
    %16 = math.rsqrt %15 : vector<16x1xf32>
    %c0_6 = arith.constant 0 : index
    %c0_7 = arith.constant 0 : index
    %17 = vector.load %arg3[%c0_6, %c0_7] : memref<1x32xf32, #tpu.memory_space<vmem>>, vector<1x32xf32>
    %18 = vector.broadcast %16 : vector<16x1xf32> to vector<16x32xf32>
    %19 = arith.mulf %8, %18 : vector<16x32xf32>
    %20 = vector.broadcast %17 : vector<1x32xf32> to vector<16x32xf32>
    %21 = arith.mulf %19, %20 : vector<16x32xf32>
    %c0_8 = arith.constant 0 : index
    %c0_9 = arith.constant 0 : index
    %22 = vector.load %arg4[%c0_8, %c0_9] : memref<16x32xf32, #tpu.memory_space<vmem>>, vector<16x32xf32>
    tpu.vector_store %arg4[%c0_8, %c0_9], %21 {strides = array<i32>} : memref<16x32xf32, #tpu.memory_space<vmem>>, vector<16x32xf32>,
    return
  }
  func.func @transform_0(%arg0: i32) -> (i32, i32) {
    %c0_i32 = arith.constant 0 : i32
    %c0_i32_0 = arith.constant 0 : i32
    return %arg0, %c0_i32 : i32, i32
  }
  func.func @transform_1(%arg0: i32) -> (i32, i32) {
    %c0_i32 = arith.constant 0 : i32
    %c0_i32_0 = arith.constant 0 : i32
    return %arg0, %c0_i32 : i32, i32
  }
  func.func @transform_2(%arg0: i32) -> (i32, i32) {
    %c0_i32 = arith.constant 0 : i32
    %c0_i32_0 = arith.constant 0 : i32
    %c0_i32_1 = arith.constant 0 : i32
    return %c0_i32, %c0_i32_0 : i32, i32
  }
  func.func @transform_3(%arg0: i32) -> (i32, i32) {
    %c0_i32 = arith.constant 0 : i32
    %c0_i32_0 = arith.constant 0 : i32
    return %arg0, %c0_i32 : i32, i32
  }
}

</mosaic_0001>

<bundles_post_ra>
// kernel: tpu_custom_call.1
= control target key start
LH: loop header
LB: loop body
LE: loop exit
PB: predicated region body
PF: predicated region fallthrough
CT: control target
= control target key end

     0   :  { %8 = vsyncpa [#allocation3], 0  ;;  %s246_s0 = inlined_call_operand.hbm [shape: f32[16,32], index: 0, kind: input, shape index: {}]   ;;  %s247_s1 = inlined_call_operand.hbm [shape: f32[16,32], index: 1, kind: input, shape index: {}]   ;;  %s248_s2 = inlined_call_operand.vmem [shape: f32[1,32], index: 2, kind: input, shape index: {}]   ;;  %s249_s3 = inlined_call_operand.hbm [shape: f32[16,32], index: 3, kind: output, shape index: {}]  }
   0x1   :  { %9 = vsyncpa [#allocation6], 0 }
   0x2   :  { %10 = vsyncpa [#allocation4], 0  ;;  %s196_s12 = smov [#allocation2]  }
   0x3   :  { %s16_s13 = sshll.u32 %s196_s12, 4  ;;  %s17_s13 = int_to_ptr.vmem [resolvable:$true] %s16_s13 }
   0x4   :  { %s138_s14 = scalar_lea.vmem %s17_s13, 256  ;;  %p143_p1 = scmp.lt.s32.totalorder %s17_s13, %s17_s13 }
   0x5   :  { %p139_p0 = scmp.ne.s32.totalorder %s17_s13, %s138_s14  ;;  %p144_p2 = scmp.lt.s32.totalorder %s138_s14, %s138_s14 }
   0x7   :  { %p145_p3 = por %p144_p2, %p143_p1 }
   0x9   :  { %p146_p4 = pnand %p145_p3, %p139_p0 }
   0xb   :  { %149 = shalt.err (!%p146_p4)
}
   0xc   :  { %s197_s15 = smov 128   ;;  %s198_s16 = smov 8  }
   0xd   :  { %22 = dma.hbm_to_vmem [thread:$0]  %s246_s0, 256, %s17_s13, [#allocation3], %s197_s15, %s197_s15, %s198_s16  }
   0xe   :  { %s199_s19 = smov [#allocation5]  }
   0xf   :  { %s28_s20 = sshll.u32 %s199_s19, 4  ;;  %s29_s20 = int_to_ptr.vmem [resolvable:$true] %s28_s20 }
  0x10   :  { %s158_s21 = scalar_lea.vmem %s29_s20, 256  ;;  %p163_p6 = scmp.lt.s32.totalorder %s29_s20, %s29_s20 }
  0x11   :  { %p159_p5 = scmp.ne.s32.totalorder %s29_s20, %s158_s21  ;;  %p164_p7 = scmp.lt.s32.totalorder %s158_s21, %s158_s21 }
  0x13   :  { %p165_p8 = por %p164_p7, %p163_p6 }
  0x15   :  { %p166_p9 = pnand %p165_p8, %p159_p5 }
  0x17   :  { %169 = shalt.err (!%p166_p9)
}
  0x18   :  { %34 = dma.hbm_to_vmem [thread:$0]  %s247_s1, 256, %s29_s20, [#allocation6], %s197_s15, %s197_s15, %s198_s16  }
  0x19   :  { %190 = dma.done.wait [#allocation3], 256  }
  0x1a   :  { %191 = vsyncadd [#allocation3], 4294967040 }
  0x1b   :  { %192 = dma.done.wait [#allocation6], 256  }
  0x1c   :  { %193 = vsyncadd [#allocation6], 4294967040  ;;  %v45_v0 = vld [vmem:[#allocation5] sm:$0xff]  ;;  %v46_v2 = vld [vmem:[#allocation5 + $0x8] sm:$0xff]  ;;  %vm65_vm0 = vcmask 261120   ;;  %s200_s24 = smov [#allocation7]  }
  0x1d   :  { %v110_v1 = vmul.f32 -1.442695, %v45_v0  ;;  %v111_v3 = vmul.f32 -1.442695, %v46_v2  ;;  %v43_v9 = vld [vmem:[#allocation2] sm:$0xff]  ;;  %v44_v12 = vld [vmem:[#allocation2 + $0x8] sm:$0xff] }
  0x1e   :  { %v112_v27 = vld [vmem:[%s248_s2] ss:$0 sm:$0xff]  ;;  %s97_s25 = sshll.u32 %s200_s24, 4  ;;  %s98_s25 = int_to_ptr.vmem [resolvable:$true] %s97_s25 }
  0x1f   :  { %118 = vpow2.f32 %v110_v1  ;;  %s170_s26 = scalar_lea.vmem %s98_s25, 256  ;;  %p175_p11 = scmp.lt.s32.totalorder %s98_s25, %s98_s25 }
  0x20   :  { %120 = vpow2.f32 %v111_v3  ;;  %p171_p10 = scmp.ne.s32.totalorder %s98_s25, %s170_s26  ;;  %p176_p12 = scmp.lt.s32.totalorder %s170_s26, %s170_s26 }
  0x22   :  { %p177_p13 = por %p176_p12, %p175_p11 }
  0x24   :  { %p178_p0 = pnand %p177_p13, %p171_p10 }
  0x2c   :  { %v119_v4 = vpop.eup %118 }
  0x2d   :  { %v121_v5 = vpop.eup %120  ;;  %v53_v6 = vadd.f32 1.0, %v119_v4 }
  0x2e   :  { %v54_v7 = vadd.f32 1.0, %v121_v5 }
  0x2f   :  { %122 = vrcp.f32 %v53_v6 }
  0x30   :  { %124 = vrcp.f32 %v54_v7 }
  0x3c   :  { %v123_v8 = vpop.eup %122 }
  0x3d   :  { %v125_v10 = vpop.eup %124  ;;  %v59_v11 = vmul.f32 %v123_v8, %v45_v0 }
  0x3e   :  { %v60_v13 = vmul.f32 %v125_v10, %v46_v2 }
  0x3f   :  { %v61_v14 = vmul.f32 %v59_v11, %v43_v9 }
  0x40   :  { %v62_v15 = vmul.f32 %v60_v13, %v44_v12 }
  0x41   :  { %v63_v16 = vmul.f32 %v61_v14, %v61_v14 }
  0x42   :  { %v64_v17 = vmul.f32 %v62_v15, %v62_v15 }
  0x43   :  { %v66_v18 = vsel %vm65_vm0, %v63_v16, 0.0 }
  0x44   :  { %67 = vadd.xlane.f32.xlu0 %v66_v18  ;;  %v69_v19 = vsel %vm65_vm0, %v64_v17, 0.0 }
  0x48   :  { %70 = vadd.xlane.f32.xlu0 %v69_v19 }
  0xcd   :  { %v68_v20 = vpop.xlane.xlu0 %67 }
  0xce   :  { %v73_v21 = vmul.f32 0.03125, %v68_v20 }
  0xd0   :  { %v75_v22 = vadd.f32 1e-05, %v73_v21 }
  0xd1   :  { %v71_v23 = vpop.xlane.xlu0 %70 }
  0xd2   :  { %126 = vrsqrt.f32 %v75_v22  ;;  %v74_v24 = vmul.f32 0.03125, %v71_v23 }
  0xd4   :  { %v76_v25 = vadd.f32 1e-05, %v74_v24 }
  0xd6   :  { %128 = vrsqrt.f32 %v76_v25 }
  0xdf   :  { %v127_v26 = vpop.eup %126 }
  0xe0   :  { %v80_v28 = vmul.f32 %v127_v26, %v61_v14 }
  0xe2   :  { %v88_v29 = vmul.f32 %v112_v27, %v80_v28 }
  0xe3   :  { %v129_v30 = vpop.eup %128 }
  0xe4   :  { %v81_v31 = vmul.f32 %v129_v30, %v62_v15  ;;  %90 = vst.msk [vmem:[#allocation7] sm:$0xff] %vm65_vm0, %v88_v29 }
  0xe6   :  { %v89_v32 = vmul.f32 %v112_v27, %v81_v31 }
  0xe8   :  { %91 = vst.msk [vmem:[#allocation7 + $0x8] sm:$0xff] %vm65_vm0, %v89_v32 }
  0xe9   :  { %181 = shalt.err (!%p178_p0)
}
  0xea   :  { %103 = dma.vmem_to_hbm [thread:$0]  %s98_s25, 256, %s249_s3, [#allocation4], %s197_s15, %s197_s15, %s198_s16  }
  0xeb   :  { %194 = dma.done.wait [#allocation4], 256  }
  0xec   :  { %195 = vsyncadd [#allocation4], 4294967040 }
  0xed   :  { %107 = vsyncpa [#allocation3], 1 }
  0xee   :  { %108 = vsyncpa [#allocation6], 1 }
  0xef   :  { %109 = vsyncpa [#allocation4], 1 }

</bundles_post_ra>
